<compile_context>
chip_gen: v7x
topology: tpu7x:2x2x1
jax: 0.10.0
libtpu: 0.0.40
codegen_flags: <defaults>
</compile_context>

<pallas_src>
import numpy as np
import jax
import jax.numpy as jnp
from jax.experimental import pallas as pl
from jax.experimental.pallas import tpu as pltpu


def _series_decomp_kernel(x_ref, w_ref, sea_ref, mean_ref):
    """Per-tile kernel: one MXU matmul over a (TILE_R, L) block."""
    xf = x_ref[...].astype(jnp.float32)
    # Combined multi-kernel moving average + edge replication as a matmul.
    acc = jnp.dot(
        xf,
        w_ref[...],
        preferred_element_type=jnp.float32,
        precision=jax.lax.Precision.HIGHEST,
    )
    mean_ref[...] = acc.astype(mean_ref.dtype)
    # sea = mean_k(x - ma_k) == x - mean_k(ma_k)
    sea_ref[...] = (xf - acc).astype(sea_ref.dtype)


def _build_weight_matrix(L, kernel_sizes):
    """W[s, t] = sum_k 1/(n*k) * #{j in [-p_k, p_k] : clamp(t + j, 0, L-1) == s}.

    moving_mean[:, t] = sum_s x[:, s] * W[s, t]  (edge replication absorbed).
    """
    n = len(kernel_sizes)
    W = np.zeros((L, L), dtype=np.float64)
    for k in kernel_sizes:
        assert k % 2 == 1, "series_decomp expects odd kernel sizes"
        p = (k - 1) // 2
        w = 1.0 / (n * k)
        for t in range(L):
            for j in range(-p, p + 1):
                s = min(max(t + j, 0), L - 1)
                W[s, t] += w
    return jnp.asarray(W, dtype=jnp.float32)


def _choose_tile_rows(n_rows, L, itemsize):
    """Row tile: dtype-aware sublane multiple, VMEM-budgeted, >= ~8 grid steps."""
    sublane = max(8, 32 // itemsize)  # 8 for f32, 16 for bf16, 32 for int8/fp8
    if n_rows <= sublane:
        return n_rows  # block dim == full array dim is always legal
    # Per-row working set: (1 in + 2 out) double-buffered blocks + f32 temps (xf, acc).
    per_row = 6 * L * itemsize + 8 * L
    budget = 8 * 1024 * 1024
    tile = budget // max(per_row, 1)
    # Keep the grid at >= ~8 steps: DMA/compute overlap and megacore splitting
    # (2 TensorCores on v7x) over the "parallel" grid axis.
    tile = min(tile, max(sublane, pl.cdiv(n_rows, 8)))
    tile = min(tile, n_rows)
    tile = max(sublane, (tile // sublane) * sublane)
    return tile


def series_decomp(x, kernel_sizes):
    """x: (B, C, L). Returns (sea, moving_mean), both (B, C, L)."""
    B, C, L = x.shape
    W = _build_weight_matrix(L, kernel_sizes)

    # Flatten batch x channel into one "row" axis; keep time (L) lane-dense.
    R = B * C
    x2d = x.reshape(R, L)
    itemsize = jnp.dtype(x.dtype).itemsize
    tile_r = _choose_tile_rows(R, L, itemsize)

    row_spec = pl.BlockSpec((tile_r, L), lambda i: (i, 0))
    # W: same block every grid step -> stays resident in VMEM (no re-DMA).
    w_spec = pl.BlockSpec((L, L), lambda i: (0, 0))

    # VMEM accounting consistent with the tile sizing: double-buffered blocks
    # (1 in + 2 out), resident W, in-kernel f32 temps; plus 2x headroom.
    # Stays under scoped defaults on all chips (v5e 16 MiB, v6e/v7x 32 MiB).
    block_bytes = tile_r * L * itemsize
    needed = 6 * block_bytes + 2 * L * L * 4 + 2 * tile_r * L * 4
    vmem_limit = int(min(max(needed * 2, 16 * 1024 * 1024), 32 * 1024 * 1024))

    cost = pl.CostEstimate(
        flops=2 * R * L * L,
        transcendentals=0,
        bytes_accessed=3 * R * L * itemsize + L * L * 4,
    )

    out_shape = (
        jax.ShapeDtypeStruct((R, L), x.dtype),
        jax.ShapeDtypeStruct((R, L), x.dtype),
    )

    # TODO(synk): lane-dense (transposed) output layout only pays off if the
    # caller can supply x as (L, B*C) for free; kept (R, L) to match the module.
    sea2d, mean2d = pl.pallas_call(
        _series_decomp_kernel,
        out_shape=out_shape,
        grid=(pl.cdiv(R, tile_r),),
        in_specs=[row_spec, w_spec],
        out_specs=(row_spec, row_spec),
        compiler_params=pltpu.CompilerParams(
            dimension_semantics=("parallel",),
            vmem_limit_bytes=vmem_limit,
        ),
        cost_estimate=cost,
    )(x2d, W)

    return sea2d.reshape(B, C, L), mean2d.reshape(B, C, L)


def _series_decomp_ref(x, kernel_sizes):
    """Pure-JAX reference mirroring the PyTorch module exactly."""
    L = x.shape[-1]
    mas, ress = [], []
    for k in kernel_sizes:
        p = (k - 1) // 2
        front = jnp.repeat(x[..., 0:1], p, axis=-1)
        end = jnp.repeat(x[..., L - 1:L], p, axis=-1)
        padded = jnp.concatenate([front, x, end], axis=-1)
        ma = jnp.stack([padded[..., j:j + L] for j in range(k)], axis=0).mean(axis=0)
        mas.append(ma)
        ress.append(x - ma)
    sea = sum(ress) / len(ress)
    mean = sum(mas) / len(mas)
    return sea, mean


if __name__ == "__main__":
    key = jax.random.PRNGKey(0)
    # Shapes consistent with the module: (batch, channels=enc_in, seq_len);
    # kernel_size = [17, 49] as in the Model's series_decomp.
    B, C, L = 2, 4, 96
    kernel_sizes = (17, 49)

    x = jax.random.normal(key, (B, C, L), dtype=jnp.float32)

    sea, moving_mean = series_decomp(x, kernel_sizes)
    sea = jax.block_until_ready(sea)
    moving_mean = jax.block_until_ready(moving_mean)

    sea_ref, mean_ref = _series_decomp_ref(x, kernel_sizes)
    assert jnp.allclose(sea, sea_ref, atol=1e-5, rtol=1e-5)
    assert jnp.allclose(moving_mean, mean_ref, atol=1e-5, rtol=1e-5)

    print("KERNEL_OK")
</pallas_src>

<mosaic_0001>
module attributes {stable_mosaic.version = 11 : i64} {
  func.func @_series_decomp_kernel(%arg0: i32, %arg1: memref<8x96xf32, #tpu.memory_space<vmem>>, %arg2: memref<96x96xf32, #tpu.memory_space<vmem>>, %arg3: memref<8x96xf32, #tpu.memory_space<vmem>>, %arg4: memref<8x96xf32, #tpu.memory_space<vmem>>) attributes {dimension_semantics = [#tpu.dimension_semantics<parallel>], iteration_bounds = array<i64: 1>, scalar_prefetch = 0 : i64, scratch_operands = 0 : i64, tpu.core_type = #tpu.core_type<tc>, window_params = [{transform_indices = @transform_0, window_bounds = array<i64: 8, 96>}, {pipeline_mode = #tpu.pipeline_mode<synchronous>, transform_indices = @transform_1, window_bounds = array<i64: 96, 96>}, {transform_indices = @transform_2, window_bounds = array<i64: 8, 96>}, {transform_indices = @transform_3, window_bounds = array<i64: 8, 96>}]} {
    %c0 = arith.constant 0 : index
    %c0_0 = arith.constant 0 : index
    %0 = vector.load %arg1[%c0, %c0_0] : memref<8x96xf32, #tpu.memory_space<vmem>>, vector<8x96xf32>
    %c0_1 = arith.constant 0 : index
    %c0_2 = arith.constant 0 : index
    %1 = vector.load %arg2[%c0_1, %c0_2] : memref<96x96xf32, #tpu.memory_space<vmem>>, vector<96x96xf32>
    %cst = arith.constant dense<0.000000e+00> : vector<8x96xf32>
    %2 = tpu.matmul %0, %1, %cst {dimension_numbers = #tpu.dot_dimension_numbers<[1], [0], [0], [1], [0, 0, 1, 1], [], []>, precision = #tpu.contract_precision<fp32>} : vector<8x96xf32>, vector<96x96xf32>, vector<8x96xf32> -> vector<8x96xf32>
    %c0_3 = arith.constant 0 : index
    %c0_4 = arith.constant 0 : index
    %3 = vector.load %arg4[%c0_3, %c0_4] : memref<8x96xf32, #tpu.memory_space<vmem>>, vector<8x96xf32>
    tpu.vector_store %arg4[%c0_3, %c0_4], %2 {strides = array<i32>} : memref<8x96xf32, #tpu.memory_space<vmem>>, vector<8x96xf32>,
    %4 = arith.subf %0, %2 : vector<8x96xf32>
    %c0_5 = arith.constant 0 : index
    %c0_6 = arith.constant 0 : index
    %5 = vector.load %arg3[%c0_5, %c0_6] : memref<8x96xf32, #tpu.memory_space<vmem>>, vector<8x96xf32>
    tpu.vector_store %arg3[%c0_5, %c0_6], %4 {strides = array<i32>} : memref<8x96xf32, #tpu.memory_space<vmem>>, vector<8x96xf32>,
    return
  }
  func.func @transform_0(%arg0: i32) -> (i32, i32) {
    %c0_i32 = arith.constant 0 : i32
    %c0_i32_0 = arith.constant 0 : i32
    return %arg0, %c0_i32 : i32, i32
  }
  func.func @transform_1(%arg0: i32) -> (i32, i32) {
    %c0_i32 = arith.constant 0 : i32
    %c0_i32_0 = arith.constant 0 : i32
    %c0_i32_1 = arith.constant 0 : i32
    return %c0_i32, %c0_i32_0 : i32, i32
  }
  func.func @transform_2(%arg0: i32) -> (i32, i32) {
    %c0_i32 = arith.constant 0 : i32
    %c0_i32_0 = arith.constant 0 : i32
    return %arg0, %c0_i32 : i32, i32
  }
  func.func @transform_3(%arg0: i32) -> (i32, i32) {
    %c0_i32 = arith.constant 0 : i32
    %c0_i32_0 = arith.constant 0 : i32
    return %arg0, %c0_i32 : i32, i32
  }
}

</mosaic_0001>

<bundles_post_ra>
// kernel: tpu_custom_call.1
= control target key start
LH: loop header
LB: loop body
LE: loop exit
PB: predicated region body
PF: predicated region fallthrough
CT: control target
= control target key end

     0   :  { %9 = vsyncpa [#allocation3], 0  ;;  %s1382_s0 = inlined_call_operand.hbm [shape: f32[8,96], index: 0, kind: input, shape index: {}]   ;;  %s1383_s1 = inlined_call_operand.hbm [shape: f32[96,96], index: 1, kind: input, shape index: {}]   ;;  %s1384_s2 = inlined_call_operand.hbm [shape: f32[8,96], index: 2, kind: output, shape index: {0}]   ;;  %s1385_s3 = inlined_call_operand.hbm [shape: f32[8,96], index: 3, kind: output, shape index: {1}]  }
   0x1   :  { %10 = vsyncpa [#allocation6], 0 }
   0x2   :  { %11 = vsyncpa [#allocation4], 0 }
   0x3   :  { %12 = vsyncpa [#allocation9], 0  ;;  %s1142_s12 = smov [#allocation2]   ;;  %s1143_s14 = smov [#allocation5]  }
   0x4   :  { %s19_s13 = sshll.u32 %s1142_s12, 4  ;;  %s28_s15 = sshll.u32 %s1143_s14, 4  ;;  %s20_s13 = int_to_ptr.vmem [resolvable:$true] %s19_s13  ;;  %s1171_s15 = int_to_ptr.vmem [resolvable:$true] %s28_s15 }
   0x5   :  { %s1046_s18 = scalar_lea.hbm %s1382_s0, 128 }
   0x6   :  { %p1047_p0 = scmp.ne.s32.totalorder %s1382_s0, %s1046_s18  ;;  %p1050_p1 = scmp.lt.u32.totalorder %s1046_s18, %s1382_s0 }
   0x8   :  { %p1052_p2 = pnand %p1050_p1, %p1047_p0 }
   0xa   :  { %1055 = shalt.err (!%p1052_p2)
}
   0xb   :  { %s1056_s23 = scalar_lea.vmem %s20_s13, 128  ;;  %p1061_p4 = scmp.lt.s32.totalorder %s20_s13, %s20_s13 }
   0xc   :  { %p1057_p3 = scmp.ne.s32.totalorder %s20_s13, %s1056_s23  ;;  %p1062_p5 = scmp.lt.s32.totalorder %s1056_s23, %s1056_s23 }
   0xe   :  { %p1063_p6 = por %p1062_p5, %p1061_p4 }
  0x10   :  { %p1064_p7 = pnand %p1063_p6, %p1057_p3 }
  0x12   :  { %1067 = shalt.err (!%p1064_p7)
}
  0x13   :  { %22 = dma.hbm_to_vmem [thread:$0]  %s1382_s0, 128, %s20_s13, [#allocation3]  }
  0x14   :  { %s1068_s28 = scalar_lea.hbm %s1383_s1, 1536 }
  0x15   :  { %p1069_p8 = scmp.ne.s32.totalorder %s1383_s1, %s1068_s28  ;;  %p1072_p9 = scmp.lt.u32.totalorder %s1068_s28, %s1383_s1 }
  0x17   :  { %p1074_p10 = pnand %p1072_p9, %p1069_p8 }
  0x19   :  { %1077 = shalt.err (!%p1074_p10)
}
  0x1a   :  { %s1078_s6 = scalar_lea.vmem %s1171_s15, 1536  ;;  %p1083_p12 = scmp.lt.s32.totalorder %s1171_s15, %s1171_s15 }
  0x1b   :  { %p1079_p11 = scmp.ne.s32.totalorder %s1171_s15, %s1078_s6  ;;  %p1084_p13 = scmp.lt.s32.totalorder %s1078_s6, %s1078_s6 }
  0x1d   :  { %p1085_p0 = por %p1084_p13, %p1083_p12 }
  0x1f   :  { %p1086_p1 = pnand %p1085_p0, %p1079_p11 }
  0x21   :  { %1089 = shalt.err (!%p1086_p1)
}
  0x22   :  { %s1144_s0 = smov 128   ;;  %s1145_s7 = smov 8  }
  0x23   :  { %34 = dma.hbm_to_vmem [thread:$0]  %s1383_s1, 1536, %s1171_s15, [#allocation6], %s1144_s0, %s1144_s0, %s1145_s7  }
  0x24   :  { %1134 = dma.done.wait [#allocation3], 128  }
  0x25   :  { %1135 = vsyncadd [#allocation3], 4294967168 }
  0x26   :  { %1136 = dma.done.wait [#allocation6], 1536  }
  0x27   :  { %1137 = vsyncadd [#allocation6], 4294965760  ;;  %v1146_v0 = vmov 0.0|0.0   ;;  %vm1147_vm0 = vmmov 0   ;;  %v1148_v1 = vmov 0.0   ;;  %v42_v2 = vld [vmem:[#allocation5] sm:$0xff] }
  0x28   :  { %920 = vmatprep.subr.bf16.mxu1 %v1146_v0  ;;  %974 = vmatprep.subr.bf16.mxu0 %v1146_v0  ;;  %v43_v3 = vld [vmem:[#allocation5 + $0x8] sm:$0xff]  ;;  %v44_v4 = vld [vmem:[#allocation5 + $0x10] sm:$0xff]  ;;  %v59_v5 = vand.u32 4294901760, %v42_v2  ;;  %v45_v7 = vld [vmem:[#allocation5 + $0x18] sm:$0xff]  ;;  %vm54_vm1 = vcmask 785408   ;;  %s1149_s1 = smov [#allocation8]  }
  0x29   :  { %782 = vmatprep.mubr.msk.f32.mxu1 %vm1147_vm0, %v1148_v1  ;;  %863 = vmatprep.mubr.msk.f32.mxu0 %vm1147_vm0, %v1148_v1  ;;  %v62_v6 = vand.u32 4294901760, %v43_v3  ;;  %v65_v8 = vand.u32 4294901760, %v44_v4  ;;  %v68_v9 = vand.u32 4294901760, %v45_v7  ;;  %v46_v10 = vld [vmem:[#allocation5 + $0x20] sm:$0xff]  ;;  %v47_v11 = vld [vmem:[#allocation5 + $0x28] sm:$0xff]  ;;  %v1210_v13 = vld [vmem:[#allocation2] sm:$0xff] }
  0x2a   :  { %v71_v15 = vand.u32 4294901760, %v46_v10  ;;  %v74_v16 = vand.u32 4294901760, %v47_v11  ;;  %v48_v17 = vld [vmem:[#allocation5 + $0x30] sm:$0xff]  ;;  %v49_v18 = vld [vmem:[#allocation5 + $0x38] sm:$0xff]  ;;  %v56_v19 = vsel %vm54_vm1, %v1210_v13, 0  ;;  %v1220_v20 = vsub.f32 %v42_v2, %v59_v5  ;;  %v50_v25 = vld [vmem:[#allocation5 + $0x40] sm:$0xff] }
  0x2b   :  { %v1208_v12 = vpack.c.bf16 %v62_v6, %v59_v5  ;;  %v1214_v14 = vpack.c.bf16 %v68_v9, %v65_v8  ;;  %v1222_v21 = vsub.f32 %v43_v3, %v62_v6  ;;  %v77_v23 = vand.u32 4294901760, %v48_v17  ;;  %v51_v27 = vld [vmem:[#allocation5 + $0x48] sm:$0xff]  ;;  %v52_v34 = vld [vmem:[#allocation5 + $0x50] sm:$0xff]  ;;  %v53_v35 = vld [vmem:[#allocation5 + $0x58] sm:$0xff]  ;;  %s666_s10 = sshll.u32 %s1149_s1, 4  ;;  %s1150_s11 = smov [#allocation7]   ;;  %s667_s10 = int_to_ptr.vmem [resolvable:$true] %s666_s10 }
  0x2c   :  { %v1226_v22 = vpack.c.bf16 %v74_v16, %v71_v15  ;;  %v80_v24 = vand.u32 4294901760, %v49_v18  ;;  %v1228_v26 = vand.u32 4294901760, %v56_v19  ;;  %v1232_v28 = vsub.f32 %v44_v4, %v65_v8  ;;  %s656_s12 = sshll.u32 %s1150_s11, 4  ;;  %s1090_s13 = scalar_lea.vmem %s667_s10, 128  ;;  %s657_s12 = int_to_ptr.vmem [resolvable:$true] %s656_s12 }
  0x2d   :  { %922 = vmatpush3.bf16.msra.mxu1 %v1208_v12  ;;  %976 = vmatpush3.bf16.msra.mxu0 %v1208_v12  ;;  %v1234_v29 = vsub.f32 %v45_v7, %v68_v9  ;;  %v83_v30 = vand.u32 4294901760, %v50_v25  ;;  %v86_v33 = vand.u32 4294901760, %v51_v27  ;;  %v148_v36 = vand.u32 4294901760, %v1220_v20  ;;  %p1091_p2 = scmp.ne.s32.totalorder %s667_s10, %s1090_s13  ;;  %p1095_p3 = scmp.lt.s32.totalorder %s667_s10, %s667_s10 }
  0x2e   :  { %923 = vmatprep.subr.bf16.mxu1 %v1146_v0  ;;  %977 = vmatprep.subr.bf16.mxu0 %v1146_v0  ;;  %v1237_v31 = vsub.f32 %v56_v19, %v1228_v26  ;;  %v1241_v32 = vpack.c.bf16 %v80_v24, %v77_v23  ;;  %v155_v37 = vand.u32 4294901760, %v1222_v21  ;;  %v1247_v38 = vsub.f32 %v46_v10, %v71_v15  ;;  %p1096_p4 = scmp.lt.s32.totalorder %s1090_s13, %s1090_s13 }
  0x2f   :  { %v1249_v39 = vsub.f32 %v47_v11, %v74_v16  ;;  %v89_v40 = vand.u32 4294901760, %v52_v34  ;;  %v92_v41 = vand.u32 4294901760, %v53_v35  ;;  %v162_v43 = vand.u32 4294901760, %v1232_v28 }
  0x30   :  { %v137_v42 = vand.u32 4294901760, %v1237_v31  ;;  %v1255_v44 = vpack.c.bf16 %v86_v33, %v83_v30  ;;  %v149_v45 = vsub.f32 %v1220_v20, %v148_v36  ;;  %v156_v46 = vsub.f32 %v1222_v21, %v155_v37  ;;  %p1097_p5 = por %p1096_p4, %p1095_p3 }
  0x31   :  { %925 = vmatpush3.bf16.msra.mxu1 %v1214_v14  ;;  %979 = vmatpush3.bf16.msra.mxu0 %v1214_v14  ;;  %v169_v47 = vand.u32 4294901760, %v1234_v29  ;;  %v1262_v48 = vsub.f32 %v48_v17, %v77_v23  ;;  %v1264_v49 = vsub.f32 %v49_v18, %v80_v24  ;;  %v163_v51 = vsub.f32 %v1232_v28, %v162_v43 }
  0x32   :  { %926 = vmatprep.subr.bf16.mxu1 %v1146_v0  ;;  %980 = vmatprep.subr.bf16.mxu0 %v1146_v0  ;;  %v138_v50 = vsub.f32 %v1237_v31, %v137_v42  ;;  %v176_v52 = vand.u32 4294901760, %v1247_v38  ;;  %v183_v53 = vand.u32 4294901760, %v1249_v39  ;;  %v1272_v54 = vpack.c.bf16 %v92_v41, %v89_v40  ;;  %p1098_p6 = pnand %p1097_p5, %p1091_p2 }
  0x33   :  { %v150_v55 = vand.u32 4294901760, %v149_v45  ;;  %v157_v56 = vand.u32 4294901760, %v156_v46  ;;  %v170_v57 = vsub.f32 %v1234_v29, %v169_v47  ;;  %v1277_v58 = vsub.f32 %v50_v25, %v83_v30 }
  0x34   :  { %v1279_v59 = vsub.f32 %v51_v27, %v86_v33  ;;  %v993_v60 = vpack.c.bf16 %v155_v37, %v148_v36  ;;  %v139_v61 = vand.u32 4294901760, %v138_v50  ;;  %v164_v62 = vand.u32 4294901760, %v163_v51 }
  0x35   :  { %928 = vmatpush3.bf16.msra.mxu1 %v1226_v22  ;;  %982 = vmatpush3.bf16.msra.mxu0 %v1226_v22  ;;  %v177_v63 = vsub.f32 %v1247_v38, %v176_v52  ;;  %v184_v2 = vsub.f32 %v1249_v39, %v183_v53  ;;  %v939_v3 = vpack.c.bf16 %v157_v56, %v150_v55  ;;  %v171_v4 = vand.u32 4294901760, %v170_v57 }
  0x36   :  { %929 = vmatprep.subr.bf16.mxu1 %v1146_v0  ;;  %983 = vmatprep.subr.bf16.mxu0 %v1146_v0  ;;  %v190_v5 = vand.u32 4294901760, %v1262_v48  ;;  %v197_v6 = vand.u32 4294901760, %v1264_v49  ;;  %v1289_v7 = vsub.f32 %v52_v34, %v89_v40  ;;  %v1291_v8 = vsub.f32 %v53_v35, %v92_v41 }
  0x37   :  { %v996_v9 = vpack.c.bf16 %v169_v47, %v162_v43  ;;  %v178_v10 = vand.u32 4294901760, %v177_v63  ;;  %v185_v11 = vand.u32 4294901760, %v184_v2  ;;  %v204_v15 = vand.u32 4294901760, %v1277_v58 }
  0x38   :  { %v942_v16 = vpack.c.bf16 %v171_v4, %v164_v62  ;;  %v191_v17 = vsub.f32 %v1262_v48, %v190_v5  ;;  %v198_v18 = vsub.f32 %v1264_v49, %v197_v6  ;;  %v211_v19 = vand.u32 4294901760, %v1279_v59 }
  0x39   :  { %931 = vmatpush3.bf16.msra.mxu1 %v1241_v32  ;;  %985 = vmatpush3.bf16.msra.mxu0 %v1241_v32  ;;  %v945_v23 = vpack.c.bf16 %v185_v11, %v178_v10  ;;  %v999_v24 = vpack.c.bf16 %v183_v53, %v176_v52  ;;  %v205_v25 = vsub.f32 %v1277_v58, %v204_v15  ;;  %v218_v27 = vand.u32 4294901760, %v1289_v7 }
  0x3a   :  { %932 = vmatprep.subr.bf16.mxu1 %v1146_v0  ;;  %986 = vmatprep.subr.bf16.mxu0 %v1146_v0  ;;  %v192_v30 = vand.u32 4294901760, %v191_v17  ;;  %v199_v33 = vand.u32 4294901760, %v198_v18  ;;  %v212_v34 = vsub.f32 %v1279_v59, %v211_v19  ;;  %v225_v35 = vand.u32 4294901760, %v1291_v8 }
  0x3b   :  { %v1002_v36 = vpack.c.bf16 %v197_v6, %v190_v5  ;;  %v219_v37 = vsub.f32 %v1289_v7, %v218_v27  ;;  %v206_v41 = vand.u32 4294901760, %v205_v25  ;;  %v1005_v46 = vpack.c.bf16 %v211_v19, %v204_v15 }
  0x3c   :  { %v948_v40 = vpack.c.bf16 %v199_v33, %v192_v30  ;;  %v226_v43 = vsub.f32 %v1291_v8, %v225_v35  ;;  %v1008_v52 = vpack.c.bf16 %v225_v35, %v218_v27  ;;  %v957_v53 = vpack.c.bf16 %v1222_v21, %v1220_v20 }
  0x3d   :  { %934 = vmatpush3.bf16.msra.mxu1 %v1255_v44  ;;  %988 = vmatpush3.bf16.msra.mxu0 %v1255_v44  ;;  %v220_v47 = vand.u32 4294901760, %v219_v37  ;;  %v960_v55 = vpack.c.bf16 %v1234_v29, %v1232_v28  ;;  %v963_v20 = vpack.c.bf16 %v1249_v39, %v1247_v38 }
  0x3e   :  { %935 = vmatprep.subr.bf16.mxu1 %v1146_v0  ;;  %989 = vmatprep.subr.bf16.mxu0 %v1146_v0  ;;  %v227_v50 = vand.u32 4294901760, %v226_v43 }
  0x40   :  { %v954_v51 = vpack.c.bf16 %v227_v50, %v220_v47 }
  0x41   :  { %937 = vmatpush3.bf16.msra.mxu1 %v1272_v54  ;;  %991 = vmatpush3.bf16.msra.mxu0 %v1272_v54 }
  0x42   :  { %938 = vmatprep.subr.bf16.mxu1 %v1146_v0  ;;  %992 = vmatprep.subr.bf16.mxu0 %v1146_v0 }
  0x44   :  { %783 = vmatmul.mubr.f32.vlgmr.msra.gmra.mrb[0].mxu1 %v139_v61  ;;  %864 = vmatmul.mubr.f32.vlgmr.msra.gmra.mrb[0].mxu0 %v137_v42  ;;  %v213_v42 = vand.u32 4294901760, %v212_v34 }
  0x45   :  { %940 = vmatpush3.bf16.msra.mxu1 %v939_v3  ;;  %994 = vmatpush3.bf16.msra.mxu0 %v993_v60 }
  0x46   :  { %941 = vmatprep.subr.bf16.mxu1 %v1146_v0  ;;  %995 = vmatprep.subr.bf16.mxu0 %v1146_v0  ;;  %v951_v45 = vpack.c.bf16 %v213_v42, %v206_v41 }
  0x47   :  { %809 = vmatprep.mubr.msk.f32.mxu1 %vm1147_vm0, %v1148_v1  ;;  %890 = vmatprep.mubr.msk.f32.mxu0 %vm1147_vm0, %v1148_v1 }
  0x49   :  { %943 = vmatpush3.bf16.msra.mxu1 %v942_v16  ;;  %997 = vmatpush3.bf16.msra.mxu0 %v996_v9 }
  0x4a   :  { %944 = vmatprep.subr.bf16.mxu1 %v1146_v0  ;;  %998 = vmatprep.subr.bf16.mxu0 %v1146_v0 }
  0x4d   :  { %946 = vmatpush3.bf16.msra.mxu1 %v945_v23  ;;  %1000 = vmatpush3.bf16.msra.mxu0 %v999_v24 }
  0x4e   :  { %947 = vmatprep.subr.bf16.mxu1 %v1146_v0  ;;  %1001 = vmatprep.subr.bf16.mxu0 %v1146_v0 }
  0x51   :  { %949 = vmatpush3.bf16.msra.mxu1 %v948_v40  ;;  %1003 = vmatpush3.bf16.msra.mxu0 %v1002_v36 }
  0x52   :  { %950 = vmatprep.subr.bf16.mxu1 %v1146_v0  ;;  %1004 = vmatprep.subr.bf16.mxu0 %v1146_v0 }
  0x55   :  { %952 = vmatpush3.bf16.msra.mxu1 %v951_v45  ;;  %1006 = vmatpush3.bf16.msra.mxu0 %v1005_v46 }
  0x56   :  { %953 = vmatprep.subr.bf16.mxu1 %v1146_v0  ;;  %1007 = vmatprep.subr.bf16.mxu0 %v1146_v0 }
  0x59   :  { %955 = vmatpush3.bf16.msra.mxu1 %v954_v51  ;;  %1009 = vmatpush3.bf16.msra.mxu0 %v1008_v52 }
  0x5a   :  { %956 = vmatprep.subr.bf16.mxu1 %v1146_v0  ;;  %1010 = vmatprep.subr.bf16.mxu0 %v1146_v0 }
  0x5c   :  { %810 = vmatmul.mubr.f32.vlgmr.msra.gmra.mrb[0].mxu1 %v1228_v26  ;;  %891 = vmatmul.mubr.f32.vlgmr.msra.gmra.mrb[0].mxu0 %v1228_v26 }
  0x5d   :  { %958 = vmatpush3.bf16.msra.mxu1 %v957_v53  ;;  %1012 = vmatpush3.bf16.msra.mxu0 %v1208_v12  ;;  %v966_v12 = vpack.c.bf16 %v1264_v49, %v1262_v48 }
  0x5e   :  { %959 = vmatprep.subr.bf16.mxu1 %v1146_v0  ;;  %1013 = vmatprep.subr.bf16.mxu0 %v1146_v0 }
  0x5f   :  { %836 = vmatprep.mubr.msk.f32.mxu1 %vm1147_vm0, %v1148_v1  ;;  %917 = vmatprep.mubr.msk.f32.mxu0 %vm1147_vm0, %v1148_v1  ;;  %v969_v1 = vpack.c.bf16 %v1279_v59, %v1277_v58 }
  0x61   :  { %961 = vmatpush3.bf16.msra.mxu1 %v960_v55  ;;  %1015 = vmatpush3.bf16.msra.mxu0 %v1214_v14  ;;  %v972_v14 = vpack.c.bf16 %v1291_v8, %v1289_v7 }
  0x62   :  { %962 = vmatprep.subr.bf16.mxu1 %v1146_v0  ;;  %1016 = vmatprep.subr.bf16.mxu0 %v1146_v0 }
  0x65   :  { %964 = vmatpush3.bf16.msra.mxu1 %v963_v20  ;;  %1018 = vmatpush3.bf16.msra.mxu0 %v1226_v22 }
  0x66   :  { %965 = vmatprep.subr.bf16.mxu1 %v1146_v0  ;;  %1019 = vmatprep.subr.bf16.mxu0 %v1146_v0 }
  0x69   :  { %967 = vmatpush3.bf16.msra.mxu1 %v966_v12  ;;  %1021 = vmatpush3.bf16.msra.mxu0 %v1241_v32 }
  0x6a   :  { %968 = vmatprep.subr.bf16.mxu1 %v1146_v0  ;;  %1022 = vmatprep.subr.bf16.mxu0 %v1146_v0 }
  0x6d   :  { %970 = vmatpush3.bf16.msra.mxu1 %v969_v1  ;;  %1024 = vmatpush3.bf16.msra.mxu0 %v1255_v44 }
  0x6e   :  { %971 = vmatprep.subr.bf16.mxu1 %v1146_v0  ;;  %1025 = vmatprep.subr.bf16.mxu0 %v1146_v0 }
  0x71   :  { %973 = vmatpush3.bf16.msra.mxu1 %v972_v14  ;;  %1027 = vmatpush3.bf16.msra.mxu0 %v1272_v54 }
  0x74   :  { %837 = vmatmul.mubr.f32.vlgmr.msra.gmra.mrb[0].mxu1 %v1237_v31  ;;  %918 = vmatmul.mubr.f32.vlgmr.msra.gmra.mrb[0].mxu0 %v1228_v26 }
 0x147   :  { %v368_v21 = vpop.f32.mrb[0].mxu1  ;;  %v643_v22 = vpop.f32.mrb[0].mxu0 }
 0x148   :  { %v1028_v28 = vadd.f32 %v643_v22, %v368_v21  ;;  %v838_v29 = vpop.f32.mrb[1].mxu1  ;;  %v919_v32 = vpop.f32.mrb[1].mxu0 }
 0x14a   :  { %v648_v38 = vsub.f32 %v1210_v13, %v1028_v28  ;;  %647 = vst.msk [vmem:[#allocation8] sm:$0xff] %vm54_vm1, %v1028_v28 }
 0x14b   :  { %1101 = shalt.err (!%p1098_p6)
}
 0x14c   :  { %s1102_s16 = scalar_lea.hbm %s1385_s3, 128 }
 0x14d   :  { %p1103_p7 = scmp.ne.s32.totalorder %s1385_s3, %s1102_s16  ;;  %p1106_p8 = scmp.lt.u32.totalorder %s1102_s16, %s1385_s3 }
 0x14f   :  { %p1108_p9 = pnand %p1106_p8, %p1103_p7 }
 0x151   :  { %1111 = shalt.err (!%p1108_p9)
}
 0x152   :  { %669 = dma.vmem_to_hbm [thread:$0]  %s667_s10, 128, %s1385_s3, [#allocation9]   ;;  %649 = vst.msk [vmem:[#allocation7] sm:$0xff] %vm54_vm1, %v648_v38 }
 0x153   :  { %s1112_s23 = scalar_lea.vmem %s657_s12, 128  ;;  %p1117_p11 = scmp.lt.s32.totalorder %s657_s12, %s657_s12 }
 0x154   :  { %p1113_p10 = scmp.ne.s32.totalorder %s657_s12, %s1112_s23  ;;  %p1118_p12 = scmp.lt.s32.totalorder %s1112_s23, %s1112_s23 }
 0x156   :  { %p1119_p13 = por %p1118_p12, %p1117_p11 }
 0x158   :  { %p1120_p0 = pnand %p1119_p13, %p1113_p10 }
 0x15a   :  { %1123 = shalt.err (!%p1120_p0)
}
 0x15b   :  { %s1124_s26 = scalar_lea.hbm %s1384_s2, 128 }
 0x15c   :  { %p1125_p1 = scmp.ne.s32.totalorder %s1384_s2, %s1124_s26  ;;  %p1128_p2 = scmp.lt.u32.totalorder %s1124_s26, %s1384_s2 }
 0x15e   :  { %p1130_p3 = pnand %p1128_p2, %p1125_p1 }
 0x160   :  { %1133 = shalt.err (!%p1130_p3)
}
 0x161   :  { %659 = dma.vmem_to_hbm [thread:$0]  %s657_s12, 128, %s1384_s2, [#allocation4]  }
 0x162   :  { %1138 = dma.done.wait [#allocation4], 128  }
 0x163   :  { %1139 = vsyncadd [#allocation4], 4294967168 }
 0x164   :  { %1140 = dma.done.wait [#allocation9], 128  }
 0x165   :  { %1141 = vsyncadd [#allocation9], 4294967168 }
 0x166   :  { %676 = vsyncpa [#allocation3], 1 }
 0x167   :  { %677 = vsyncpa [#allocation6], 1 }
 0x168   :  { %678 = vsyncpa [#allocation4], 1 }
 0x169   :  { %679 = vsyncpa [#allocation9], 1 }

</bundles_post_ra>
